<compile_context>
chip_gen: v7x
topology: tpu7x:2x2x1
jax: 0.10.0
libtpu: 0.0.40
codegen_flags: <defaults>
</compile_context>

<pallas_src>
import functools

import jax
import jax.numpy as jnp
from jax.experimental import pallas as pl
from jax.experimental.pallas import tpu as pltpu


# ----------------------------------------------------------------------------
# Single fused Pallas kernel: input projection + GRU recurrence + FC + sigmoid
# ----------------------------------------------------------------------------
def _gru_discriminator_kernel(x_ref, wih_ref, whh_ref, bih_ref, bhh_ref,
                              wfc_ref, bfc_ref, out_ref, xg_ref, hall_ref,
                              *, time_step, batch, hidden):
    """x_ref   : (T*Bp, D)   time-major rows, row order (t, b)
       wih_ref : (D, 3H)     gate order r|z|n (PyTorch order), pre-transposed
       whh_ref : (H, 3H)
       bih_ref : (1, 3H)     bhh_ref : (1, 3H)
       wfc_ref : (H, O)      bfc_ref : (1, O)
       out_ref : (T*Bp, O)   sigmoid(Linear(h_t))
       xg_ref  : (T*Bp, 3H)  scratch: input-gate pre-activations, all steps
       hall_ref: (T*Bp, H)   scratch: hidden state for every step
    """
    T, Bp, H = time_step, batch, hidden

    # Input projection for ALL time steps in one MXU matmul (W_ih x_t + b_ih).
    xg_ref[...] = (jnp.dot(x_ref[...], wih_ref[...],
                           preferred_element_type=jnp.float32)
                   + bih_ref[...])

    # Sequential GRU recurrence (h0 = 0).  T is small and static -> unrolled,
    # so all ref slices below use static, sublane-aligned offsets.
    h = jnp.zeros((Bp, H), jnp.float32)
    for t in range(T):
        lo = t * Bp
        xg_t = xg_ref[lo:lo + Bp, :]                          # (Bp, 3H)
        hg = (jnp.dot(h, whh_ref[...],
                      preferred_element_type=jnp.float32)
              + bhh_ref[...])                                 # (Bp, 3H)
        r = jax.nn.sigmoid(xg_t[:, 0:H] + hg[:, 0:H])
        z = jax.nn.sigmoid(xg_t[:, H:2 * H] + hg[:, H:2 * H])
        n = jnp.tanh(xg_t[:, 2 * H:3 * H] + r * hg[:, 2 * H:3 * H])
        h = (1.0 - z) * n + z * h
        hall_ref[lo:lo + Bp, :] = h

    # Fused classifier head: Linear(hidden -> output) + Sigmoid, one matmul
    # over all (t, b) rows, single lane store.
    out_ref[...] = jax.nn.sigmoid(
        jnp.dot(hall_ref[...], wfc_ref[...],
                preferred_element_type=jnp.float32)
        + bfc_ref[...])


def gru_discriminator_pallas(x2d, w_ih, w_hh, b_ih, b_hh, w_fc, b_fc,
                             *, time_step, batch, hidden):
    TB, _ = x2d.shape
    out_dim = w_fc.shape[1]
    kernel = functools.partial(_gru_discriminator_kernel,
                               time_step=time_step, batch=batch, hidden=hidden)
    vmem_spec = pl.BlockSpec(memory_space=pltpu.MemorySpace.VMEM)
    return pl.pallas_call(
        kernel,
        out_shape=jax.ShapeDtypeStruct((TB, out_dim), jnp.float32),
        in_specs=[vmem_spec] * 7,
        out_specs=vmem_spec,
        scratch_shapes=[
            pltpu.VMEM((TB, 3 * hidden), jnp.float32),   # xg (input gates)
            pltpu.VMEM((TB, hidden), jnp.float32),       # all hidden states
        ],
    )(x2d, w_ih, w_hh, b_ih, b_hh, w_fc, b_fc)


# ----------------------------------------------------------------------------
# Parameters + host-side forward glue
# ----------------------------------------------------------------------------
def init_params(key, label_dim, hidden_dim, output_dim):
    """Deterministic synthetic init mimicking PyTorch defaults.
    All matmul weights are stored pre-transposed as [K, N] (perf feedback)."""
    in_dim = 1 + label_dim
    ks = jax.random.split(key, 7)
    s = 1.0 / float(hidden_dim) ** 0.5

    def u(k, shape):
        return jax.random.uniform(k, shape, jnp.float32, -s, s)

    return {
        "emb": jax.random.normal(ks[0], (label_dim, label_dim), jnp.float32),
        "w_ih": u(ks[1], (in_dim, 3 * hidden_dim)),      # gate order r|z|n
        "w_hh": u(ks[2], (hidden_dim, 3 * hidden_dim)),
        "b_ih": u(ks[3], (1, 3 * hidden_dim)),
        "b_hh": u(ks[4], (1, 3 * hidden_dim)),
        "w_fc": u(ks[5], (hidden_dim, output_dim)),
        "b_fc": u(ks[6], (1, output_dim)),
    }


def ts_discriminator_forward(params, data, labels):
    """data: (B, T, 1) f32, labels: (B,) int -> out: (B, T, output_dim)."""
    B, T, _ = data.shape
    L = params["emb"].shape[0]
    H = params["w_hh"].shape[0]
    O = params["w_fc"].shape[1]

    # Embedding lookup (tiny gather) + tile over time + concat -> time-major x.
    emb = jnp.take(params["emb"], labels, axis=0)               # (B, L)
    x = jnp.concatenate(
        [jnp.transpose(data, (1, 0, 2)),                        # (T, B, 1)
         jnp.broadcast_to(emb[None, :, :], (T, B, L))],         # (T, B, L)
        axis=2)                                                 # (T, B, 1+L)

    # Pad batch once to a sublane multiple so in-kernel slices stay aligned.
    Bp = ((B + 7) // 8) * 8
    if Bp != B:
        x = jnp.pad(x, ((0, 0), (0, Bp - B), (0, 0)))
    x2d = x.reshape(T * Bp, 1 + L)

    out2d = gru_discriminator_pallas(
        x2d, params["w_ih"], params["w_hh"], params["b_ih"], params["b_hh"],
        params["w_fc"], params["b_fc"],
        time_step=T, batch=Bp, hidden=H)                        # (T*Bp, O)

    out = out2d.reshape(T, Bp, O)[:, :B, :]                     # (T, B, O)
    return jnp.transpose(out, (1, 0, 2))                        # (B, T, O)


# ----------------------------------------------------------------------------
# Pure-JAX reference (for correctness check)
# ----------------------------------------------------------------------------
def reference_forward(params, data, labels):
    B, T, _ = data.shape
    L = params["emb"].shape[0]
    H = params["w_hh"].shape[0]
    emb = params["emb"][labels]
    x = jnp.concatenate(
        [jnp.transpose(data, (1, 0, 2)),
         jnp.broadcast_to(emb[None, :, :], (T, B, L))], axis=2)
    h = jnp.zeros((B, H), jnp.float32)
    hs = []
    for t in range(T):
        xg = x[t] @ params["w_ih"] + params["b_ih"]
        hg = h @ params["w_hh"] + params["b_hh"]
        r = jax.nn.sigmoid(xg[:, :H] + hg[:, :H])
        z = jax.nn.sigmoid(xg[:, H:2 * H] + hg[:, H:2 * H])
        n = jnp.tanh(xg[:, 2 * H:] + r * hg[:, 2 * H:])
        h = (1.0 - z) * n + z * h
        hs.append(h)
    hseq = jnp.stack(hs, axis=0)                                # (T, B, H)
    out = jax.nn.sigmoid(hseq @ params["w_fc"] + params["b_fc"])
    return jnp.transpose(out, (1, 0, 2))


if __name__ == "__main__":
    batch, time_step, label_dim, hidden_dim, output_dim = 2, 8, 4, 32, 1

    key = jax.random.PRNGKey(0)
    kp, kd, kl = jax.random.split(key, 3)
    params = init_params(kp, label_dim, hidden_dim, output_dim)

    data = jax.random.normal(kd, (batch, time_step, 1), jnp.float32)
    labels = jax.random.randint(kl, (batch,), 0, label_dim)

    out = ts_discriminator_forward(params, data, labels)
    out = jax.block_until_ready(out)

    assert out.shape == (batch, time_step, output_dim)
    assert bool(jnp.all(jnp.isfinite(out)))
    assert bool(jnp.all((out >= 0.0) & (out <= 1.0)))           # sigmoid range

    ref = reference_forward(params, data, labels)
    assert bool(jnp.allclose(out, ref, atol=1e-3, rtol=1e-3))

    print("KERNEL_OK")
</pallas_src>

<mosaic_0001>
module attributes {stable_mosaic.version = 11 : i64} {
  func.func @_gru_discriminator_kernel(%arg0: memref<64x5xf32, #tpu.memory_space<vmem>>, %arg1: memref<5x96xf32, #tpu.memory_space<vmem>>, %arg2: memref<32x96xf32, #tpu.memory_space<vmem>>, %arg3: memref<1x96xf32, #tpu.memory_space<vmem>>, %arg4: memref<1x96xf32, #tpu.memory_space<vmem>>, %arg5: memref<32x1xf32, #tpu.memory_space<vmem>>, %arg6: memref<1x1xf32, #tpu.memory_space<vmem>>, %arg7: memref<64x1xf32, #tpu.memory_space<vmem>>, %arg8: memref<64x96xf32, #tpu.memory_space<vmem>>, %arg9: memref<64x32xf32, #tpu.memory_space<vmem>>) attributes {dimension_semantics = [], scalar_prefetch = 0 : i64, scratch_operands = 2 : i64, tpu.core_type = #tpu.core_type<tc>} {
    %c0 = arith.constant 0 : index
    %c0_0 = arith.constant 0 : index
    %0 = vector.load %arg0[%c0, %c0_0] : memref<64x5xf32, #tpu.memory_space<vmem>>, vector<64x5xf32>
    %c0_1 = arith.constant 0 : index
    %c0_2 = arith.constant 0 : index
    %1 = vector.load %arg1[%c0_1, %c0_2] : memref<5x96xf32, #tpu.memory_space<vmem>>, vector<5x96xf32>
    %cst = arith.constant dense<0.000000e+00> : vector<64x96xf32>
    %2 = tpu.matmul %0, %1, %cst {dimension_numbers = #tpu.dot_dimension_numbers<[1], [0], [0], [1], [0, 0, 1, 1], [], []>} : vector<64x5xf32>, vector<5x96xf32>, vector<64x96xf32> -> vector<64x96xf32>
    %c0_3 = arith.constant 0 : index
    %c0_4 = arith.constant 0 : index
    %3 = vector.load %arg3[%c0_3, %c0_4] : memref<1x96xf32, #tpu.memory_space<vmem>>, vector<1x96xf32>
    %4 = vector.broadcast %3 : vector<1x96xf32> to vector<64x96xf32>
    %5 = arith.addf %2, %4 : vector<64x96xf32>
    %c0_5 = arith.constant 0 : index
    %c0_6 = arith.constant 0 : index
    %6 = vector.load %arg8[%c0_5, %c0_6] : memref<64x96xf32, #tpu.memory_space<vmem>>, vector<64x96xf32>
    tpu.vector_store %arg8[%c0_5, %c0_6], %5 {strides = array<i32>} : memref<64x96xf32, #tpu.memory_space<vmem>>, vector<64x96xf32>,
    %cst_7 = arith.constant 0.000000e+00 : f32
    %7 = vector.broadcast %cst_7 : f32 to vector<8x32xf32>
    %c0_8 = arith.constant 0 : index
    %c0_9 = arith.constant 0 : index
    %8 = vector.load %arg8[%c0_8, %c0_9] : memref<64x96xf32, #tpu.memory_space<vmem>>, vector<8x96xf32>
    %c0_10 = arith.constant 0 : index
    %c0_11 = arith.constant 0 : index
    %9 = vector.load %arg2[%c0_10, %c0_11] : memref<32x96xf32, #tpu.memory_space<vmem>>, vector<32x96xf32>
    %cst_12 = arith.constant dense<0.000000e+00> : vector<8x96xf32>
    %10 = tpu.matmul %7, %9, %cst_12 {dimension_numbers = #tpu.dot_dimension_numbers<[1], [0], [0], [1], [0, 0, 1, 1], [], []>} : vector<8x32xf32>, vector<32x96xf32>, vector<8x96xf32> -> vector<8x96xf32>
    %c0_13 = arith.constant 0 : index
    %c0_14 = arith.constant 0 : index
    %11 = vector.load %arg4[%c0_13, %c0_14] : memref<1x96xf32, #tpu.memory_space<vmem>>, vector<1x96xf32>
    %12 = vector.broadcast %11 : vector<1x96xf32> to vector<8x96xf32>
    %13 = arith.addf %10, %12 : vector<8x96xf32>
    %14 = vector.extract_strided_slice %8 {offsets = [0, 0], sizes = [8, 32], strides = [1, 1]} : vector<8x96xf32> to vector<8x32xf32>
    %15 = vector.extract_strided_slice %13 {offsets = [0, 0], sizes = [8, 32], strides = [1, 1]} : vector<8x96xf32> to vector<8x32xf32>
    %16 = arith.addf %14, %15 : vector<8x32xf32>
    %17 = arith.negf %16 : vector<8x32xf32>
    %18 = math.exp %17 : vector<8x32xf32>
    %cst_15 = arith.constant 1.000000e+00 : f32
    %19 = vector.broadcast %cst_15 : f32 to vector<8x32xf32>
    %20 = arith.addf %19, %18 : vector<8x32xf32>
    %21 = arith.divf %19, %20 : vector<8x32xf32>
    %22 = vector.extract_strided_slice %8 {offsets = [0, 32], sizes = [8, 32], strides = [1, 1]} : vector<8x96xf32> to vector<8x32xf32>
    %23 = vector.extract_strided_slice %13 {offsets = [0, 32], sizes = [8, 32], strides = [1, 1]} : vector<8x96xf32> to vector<8x32xf32>
    %24 = arith.addf %22, %23 : vector<8x32xf32>
    %25 = arith.negf %24 : vector<8x32xf32>
    %26 = math.exp %25 : vector<8x32xf32>
    %cst_16 = arith.constant 1.000000e+00 : f32
    %27 = vector.broadcast %cst_16 : f32 to vector<8x32xf32>
    %28 = arith.addf %27, %26 : vector<8x32xf32>
    %29 = arith.divf %27, %28 : vector<8x32xf32>
    %30 = vector.extract_strided_slice %8 {offsets = [0, 64], sizes = [8, 32], strides = [1, 1]} : vector<8x96xf32> to vector<8x32xf32>
    %31 = vector.extract_strided_slice %13 {offsets = [0, 64], sizes = [8, 32], strides = [1, 1]} : vector<8x96xf32> to vector<8x32xf32>
    %32 = arith.mulf %21, %31 : vector<8x32xf32>
    %33 = arith.addf %30, %32 : vector<8x32xf32>
    %34 = math.tanh %33 : vector<8x32xf32>
    %cst_17 = arith.constant 1.000000e+00 : f32
    %35 = vector.broadcast %cst_17 : f32 to vector<8x32xf32>
    %36 = arith.subf %35, %29 : vector<8x32xf32>
    %37 = arith.mulf %36, %34 : vector<8x32xf32>
    %38 = arith.mulf %29, %7 : vector<8x32xf32>
    %39 = arith.addf %37, %38 : vector<8x32xf32>
    %c0_18 = arith.constant 0 : index
    %c0_19 = arith.constant 0 : index
    %40 = vector.load %arg9[%c0_18, %c0_19] : memref<64x32xf32, #tpu.memory_space<vmem>>, vector<8x32xf32>
    tpu.vector_store %arg9[%c0_18, %c0_19], %39 {strides = array<i32>} : memref<64x32xf32, #tpu.memory_space<vmem>>, vector<8x32xf32>,
    %c8 = arith.constant 8 : index
    %c0_20 = arith.constant 0 : index
    %41 = vector.load %arg8[%c8, %c0_20] : memref<64x96xf32, #tpu.memory_space<vmem>>, vector<8x96xf32>
    %c0_21 = arith.constant 0 : index
    %c0_22 = arith.constant 0 : index
    %42 = vector.load %arg2[%c0_21, %c0_22] : memref<32x96xf32, #tpu.memory_space<vmem>>, vector<32x96xf32>
    %cst_23 = arith.constant dense<0.000000e+00> : vector<8x96xf32>
    %43 = tpu.matmul %39, %42, %cst_23 {dimension_numbers = #tpu.dot_dimension_numbers<[1], [0], [0], [1], [0, 0, 1, 1], [], []>} : vector<8x32xf32>, vector<32x96xf32>, vector<8x96xf32> -> vector<8x96xf32>
    %c0_24 = arith.constant 0 : index
    %c0_25 = arith.constant 0 : index
    %44 = vector.load %arg4[%c0_24, %c0_25] : memref<1x96xf32, #tpu.memory_space<vmem>>, vector<1x96xf32>
    %45 = vector.broadcast %44 : vector<1x96xf32> to vector<8x96xf32>
    %46 = arith.addf %43, %45 : vector<8x96xf32>
    %47 = vector.extract_strided_slice %41 {offsets = [0, 0], sizes = [8, 32], strides = [1, 1]} : vector<8x96xf32> to vector<8x32xf32>
    %48 = vector.extract_strided_slice %46 {offsets = [0, 0], sizes = [8, 32], strides = [1, 1]} : vector<8x96xf32> to vector<8x32xf32>
    %49 = arith.addf %47, %48 : vector<8x32xf32>
    %50 = arith.negf %49 : vector<8x32xf32>
    %51 = math.exp %50 : vector<8x32xf32>
    %cst_26 = arith.constant 1.000000e+00 : f32
    %52 = vector.broadcast %cst_26 : f32 to vector<8x32xf32>
    %53 = arith.addf %52, %51 : vector<8x32xf32>
    %54 = arith.divf %52, %53 : vector<8x32xf32>
    %55 = vector.extract_strided_slice %41 {offsets = [0, 32], sizes = [8, 32], strides = [1, 1]} : vector<8x96xf32> to vector<8x32xf32>
    %56 = vector.extract_strided_slice %46 {offsets = [0, 32], sizes = [8, 32], strides = [1, 1]} : vector<8x96xf32> to vector<8x32xf32>
    %57 = arith.addf %55, %56 : vector<8x32xf32>
    %58 = arith.negf %57 : vector<8x32xf32>
    %59 = math.exp %58 : vector<8x32xf32>
    %cst_27 = arith.constant 1.000000e+00 : f32
    %60 = vector.broadcast %cst_27 : f32 to vector<8x32xf32>
    %61 = arith.addf %60, %59 : vector<8x32xf32>
    %62 = arith.divf %60, %61 : vector<8x32xf32>
    %63 = vector.extract_strided_slice %41 {offsets = [0, 64], sizes = [8, 32], strides = [1, 1]} : vector<8x96xf32> to vector<8x32xf32>
    %64 = vector.extract_strided_slice %46 {offsets = [0, 64], sizes = [8, 32], strides = [1, 1]} : vector<8x96xf32> to vector<8x32xf32>
    %65 = arith.mulf %54, %64 : vector<8x32xf32>
    %66 = arith.addf %63, %65 : vector<8x32xf32>
    %67 = math.tanh %66 : vector<8x32xf32>
    %cst_28 = arith.constant 1.000000e+00 : f32
    %68 = vector.broadcast %cst_28 : f32 to vector<8x32xf32>
    %69 = arith.subf %68, %62 : vector<8x32xf32>
    %70 = arith.mulf %69, %67 : vector<8x32xf32>
    %71 = arith.mulf %62, %39 : vector<8x32xf32>
    %72 = arith.addf %70, %71 : vector<8x32xf32>
    %c8_29 = arith.constant 8 : index
    %c0_30 = arith.constant 0 : index
    %73 = vector.load %arg9[%c8_29, %c0_30] : memref<64x32xf32, #tpu.memory_space<vmem>>, vector<8x32xf32>
    tpu.vector_store %arg9[%c8_29, %c0_30], %72 {strides = array<i32>} : memref<64x32xf32, #tpu.memory_space<vmem>>, vector<8x32xf32>,
    %c16 = arith.constant 16 : index
    %c0_31 = arith.constant 0 : index
    %74 = vector.load %arg8[%c16, %c0_31] : memref<64x96xf32, #tpu.memory_space<vmem>>, vector<8x96xf32>
    %c0_32 = arith.constant 0 : index
    %c0_33 = arith.constant 0 : index
    %75 = vector.load %arg2[%c0_32, %c0_33] : memref<32x96xf32, #tpu.memory_space<vmem>>, vector<32x96xf32>
    %cst_34 = arith.constant dense<0.000000e+00> : vector<8x96xf32>
    %76 = tpu.matmul %72, %75, %cst_34 {dimension_numbers = #tpu.dot_dimension_numbers<[1], [0], [0], [1], [0, 0, 1, 1], [], []>} : vector<8x32xf32>, vector<32x96xf32>, vector<8x96xf32> -> vector<8x96xf32>
    %c0_35 = arith.constant 0 : index
    %c0_36 = arith.constant 0 : index
    %77 = vector.load %arg4[%c0_35, %c0_36] : memref<1x96xf32, #tpu.memory_space<vmem>>, vector<1x96xf32>
    %78 = vector.broadcast %77 : vector<1x96xf32> to vector<8x96xf32>
    %79 = arith.addf %76, %78 : vector<8x96xf32>
    %80 = vector.extract_strided_slice %74 {offsets = [0, 0], sizes = [8, 32], strides = [1, 1]} : vector<8x96xf32> to vector<8x32xf32>
    %81 = vector.extract_strided_slice %79 {offsets = [0, 0], sizes = [8, 32], strides = [1, 1]} : vector<8x96xf32> to vector<8x32xf32>
    %82 = arith.addf %80, %81 : vector<8x32xf32>
    %83 = arith.negf %82 : vector<8x32xf32>
    %84 = math.exp %83 : vector<8x32xf32>
    %cst_37 = arith.constant 1.000000e+00 : f32
    %85 = vector.broadcast %cst_37 : f32 to vector<8x32xf32>
    %86 = arith.addf %85, %84 : vector<8x32xf32>
    %87 = arith.divf %85, %86 : vector<8x32xf32>
    %88 = vector.extract_strided_slice %74 {offsets = [0, 32], sizes = [8, 32], strides = [1, 1]} : vector<8x96xf32> to vector<8x32xf32>
    %89 = vector.extract_strided_slice %79 {offsets = [0, 32], sizes = [8, 32], strides = [1, 1]} : vector<8x96xf32> to vector<8x32xf32>
    %90 = arith.addf %88, %89 : vector<8x32xf32>
    %91 = arith.negf %90 : vector<8x32xf32>
    %92 = math.exp %91 : vector<8x32xf32>
    %cst_38 = arith.constant 1.000000e+00 : f32
    %93 = vector.broadcast %cst_38 : f32 to vector<8x32xf32>
    %94 = arith.addf %93, %92 : vector<8x32xf32>
    %95 = arith.divf %93, %94 : vector<8x32xf32>
    %96 = vector.extract_strided_slice %74 {offsets = [0, 64], sizes = [8, 32], strides = [1, 1]} : vector<8x96xf32> to vector<8x32xf32>
    %97 = vector.extract_strided_slice %79 {offsets = [0, 64], sizes = [8, 32], strides = [1, 1]} : vector<8x96xf32> to vector<8x32xf32>
    %98 = arith.mulf %87, %97 : vector<8x32xf32>
    %99 = arith.addf %96, %98 : vector<8x32xf32>
    %100 = math.tanh %99 : vector<8x32xf32>
    %cst_39 = arith.constant 1.000000e+00 : f32
    %101 = vector.broadcast %cst_39 : f32 to vector<8x32xf32>
    %102 = arith.subf %101, %95 : vector<8x32xf32>
    %103 = arith.mulf %102, %100 : vector<8x32xf32>
    %104 = arith.mulf %95, %72 : vector<8x32xf32>
    %105 = arith.addf %103, %104 : vector<8x32xf32>
    %c16_40 = arith.constant 16 : index
    %c0_41 = arith.constant 0 : index
    %106 = vector.load %arg9[%c16_40, %c0_41] : memref<64x32xf32, #tpu.memory_space<vmem>>, vector<8x32xf32>
    tpu.vector_store %arg9[%c16_40, %c0_41], %105 {strides = array<i32>} : memref<64x32xf32, #tpu.memory_space<vmem>>, vector<8x32xf32>,
    %c24 = arith.constant 24 : index
    %c0_42 = arith.constant 0 : index
    %107 = vector.load %arg8[%c24, %c0_42] : memref<64x96xf32, #tpu.memory_space<vmem>>, vector<8x96xf32>
    %c0_43 = arith.constant 0 : index
    %c0_44 = arith.constant 0 : index
    %108 = vector.load %arg2[%c0_43, %c0_44] : memref<32x96xf32, #tpu.memory_space<vmem>>, vector<32x96xf32>
    %cst_45 = arith.constant dense<0.000000e+00> : vector<8x96xf32>
    %109 = tpu.matmul %105, %108, %cst_45 {dimension_numbers = #tpu.dot_dimension_numbers<[1], [0], [0], [1], [0, 0, 1, 1], [], []>} : vector<8x32xf32>, vector<32x96xf32>, vector<8x96xf32> -> vector<8x96xf32>
    %c0_46 = arith.constant 0 : index
    %c0_47 = arith.constant 0 : index
    %110 = vector.load %arg4[%c0_46, %c0_47] : memref<1x96xf32, #tpu.memory_space<vmem>>, vector<1x96xf32>
    %111 = vector.broadcast %110 : vector<1x96xf32> to vector<8x96xf32>
    %112 = arith.addf %109, %111 : vector<8x96xf32>
    %113 = vector.extract_strided_slice %107 {offsets = [0, 0], sizes = [8, 32], strides = [1, 1]} : vector<8x96xf32> to vector<8x32xf32>
    %114 = vector.extract_strided_slice %112 {offsets = [0, 0], sizes = [8, 32], strides = [1, 1]} : vector<8x96xf32> to vector<8x32xf32>
    %115 = arith.addf %113, %114 : vector<8x32xf32>
    %116 = arith.negf %115 : vector<8x32xf32>
    %117 = math.exp %116 : vector<8x32xf32>
    %cst_48 = arith.constant 1.000000e+00 : f32
    %118 = vector.broadcast %cst_48 : f32 to vector<8x32xf32>
    %119 = arith.addf %118, %117 : vector<8x32xf32>
    %120 = arith.divf %118, %119 : vector<8x32xf32>
    %121 = vector.extract_strided_slice %107 {offsets = [0, 32], sizes = [8, 32], strides = [1, 1]} : vector<8x96xf32> to vector<8x32xf32>
    %122 = vector.extract_strided_slice %112 {offsets = [0, 32], sizes = [8, 32], strides = [1, 1]} : vector<8x96xf32> to vector<8x32xf32>
    %123 = arith.addf %121, %122 : vector<8x32xf32>
    %124 = arith.negf %123 : vector<8x32xf32>
    %125 = math.exp %124 : vector<8x32xf32>
    %cst_49 = arith.constant 1.000000e+00 : f32
    %126 = vector.broadcast %cst_49 : f32 to vector<8x32xf32>
    %127 = arith.addf %126, %125 : vector<8x32xf32>
    %128 = arith.divf %126, %127 : vector<8x32xf32>
    %129 = vector.extract_strided_slice %107 {offsets = [0, 64], sizes = [8, 32], strides = [1, 1]} : vector<8x96xf32> to vector<8x32xf32>
    %130 = vector.extract_strided_slice %112 {offsets = [0, 64], sizes = [8, 32], strides = [1, 1]} : vector<8x96xf32> to vector<8x32xf32>
    %131 = arith.mulf %120, %130 : vector<8x32xf32>
    %132 = arith.addf %129, %131 : vector<8x32xf32>
    %133 = math.tanh %132 : vector<8x32xf32>
    %cst_50 = arith.constant 1.000000e+00 : f32
    %134 = vector.broadcast %cst_50 : f32 to vector<8x32xf32>
    %135 = arith.subf %134, %128 : vector<8x32xf32>
    %136 = arith.mulf %135, %133 : vector<8x32xf32>
    %137 = arith.mulf %128, %105 : vector<8x32xf32>
    %138 = arith.addf %136, %137 : vector<8x32xf32>
    %c24_51 = arith.constant 24 : index
    %c0_52 = arith.constant 0 : index
    %139 = vector.load %arg9[%c24_51, %c0_52] : memref<64x32xf32, #tpu.memory_space<vmem>>, vector<8x32xf32>
    tpu.vector_store %arg9[%c24_51, %c0_52], %138 {strides = array<i32>} : memref<64x32xf32, #tpu.memory_space<vmem>>, vector<8x32xf32>,
    %c32 = arith.constant 32 : index
    %c0_53 = arith.constant 0 : index
    %140 = vector.load %arg8[%c32, %c0_53] : memref<64x96xf32, #tpu.memory_space<vmem>>, vector<8x96xf32>
    %c0_54 = arith.constant 0 : index
    %c0_55 = arith.constant 0 : index
    %141 = vector.load %arg2[%c0_54, %c0_55] : memref<32x96xf32, #tpu.memory_space<vmem>>, vector<32x96xf32>
    %cst_56 = arith.constant dense<0.000000e+00> : vector<8x96xf32>
    %142 = tpu.matmul %138, %141, %cst_56 {dimension_numbers = #tpu.dot_dimension_numbers<[1], [0], [0], [1], [0, 0, 1, 1], [], []>} : vector<8x32xf32>, vector<32x96xf32>, vector<8x96xf32> -> vector<8x96xf32>
    %c0_57 = arith.constant 0 : index
    %c0_58 = arith.constant 0 : index
    %143 = vector.load %arg4[%c0_57, %c0_58] : memref<1x96xf32, #tpu.memory_space<vmem>>, vector<1x96xf32>
    %144 = vector.broadcast %143 : vector<1x96xf32> to vector<8x96xf32>
    %145 = arith.addf %142, %144 : vector<8x96xf32>
    %146 = vector.extract_strided_slice %140 {offsets = [0, 0], sizes = [8, 32], strides = [1, 1]} : vector<8x96xf32> to vector<8x32xf32>
    %147 = vector.extract_strided_slice %145 {offsets = [0, 0], sizes = [8, 32], strides = [1, 1]} : vector<8x96xf32> to vector<8x32xf32>
    %148 = arith.addf %146, %147 : vector<8x32xf32>
    %149 = arith.negf %148 : vector<8x32xf32>
    %150 = math.exp %149 : vector<8x32xf32>
    %cst_59 = arith.constant 1.000000e+00 : f32
    %151 = vector.broadcast %cst_59 : f32 to vector<8x32xf32>
    %152 = arith.addf %151, %150 : vector<8x32xf32>
    %153 = arith.divf %151, %152 : vector<8x32xf32>
    %154 = vector.extract_strided_slice %140 {offsets = [0, 32], sizes = [8, 32], strides = [1, 1]} : vector<8x96xf32> to vector<8x32xf32>
    %155 = vector.extract_strided_slice %145 {offsets = [0, 32], sizes = [8, 32], strides = [1, 1]} : vector<8x96xf32> to vector<8x32xf32>
    %156 = arith.addf %154, %155 : vector<8x32xf32>
    %157 = arith.negf %156 : vector<8x32xf32>
    %158 = math.exp %157 : vector<8x32xf32>
    %cst_60 = arith.constant 1.000000e+00 : f32
    %159 = vector.broadcast %cst_60 : f32 to vector<8x32xf32>
    %160 = arith.addf %159, %158 : vector<8x32xf32>
    %161 = arith.divf %159, %160 : vector<8x32xf32>
    %162 = vector.extract_strided_slice %140 {offsets = [0, 64], sizes = [8, 32], strides = [1, 1]} : vector<8x96xf32> to vector<8x32xf32>
    %163 = vector.extract_strided_slice %145 {offsets = [0, 64], sizes = [8, 32], strides = [1, 1]} : vector<8x96xf32> to vector<8x32xf32>
    %164 = arith.mulf %153, %163 : vector<8x32xf32>
    %165 = arith.addf %162, %164 : vector<8x32xf32>
    %166 = math.tanh %165 : vector<8x32xf32>
    %cst_61 = arith.constant 1.000000e+00 : f32
    %167 = vector.broadcast %cst_61 : f32 to vector<8x32xf32>
    %168 = arith.subf %167, %161 : vector<8x32xf32>
    %169 = arith.mulf %168, %166 : vector<8x32xf32>
    %170 = arith.mulf %161, %138 : vector<8x32xf32>
    %171 = arith.addf %169, %170 : vector<8x32xf32>
    %c32_62 = arith.constant 32 : index
    %c0_63 = arith.constant 0 : index
    %172 = vector.load %arg9[%c32_62, %c0_63] : memref<64x32xf32, #tpu.memory_space<vmem>>, vector<8x32xf32>
    tpu.vector_store %arg9[%c32_62, %c0_63], %171 {strides = array<i32>} : memref<64x32xf32, #tpu.memory_space<vmem>>, vector<8x32xf32>,
    %c40 = arith.constant 40 : index
    %c0_64 = arith.constant 0 : index
    %173 = vector.load %arg8[%c40, %c0_64] : memref<64x96xf32, #tpu.memory_space<vmem>>, vector<8x96xf32>
    %c0_65 = arith.constant 0 : index
    %c0_66 = arith.constant 0 : index
    %174 = vector.load %arg2[%c0_65, %c0_66] : memref<32x96xf32, #tpu.memory_space<vmem>>, vector<32x96xf32>
    %cst_67 = arith.constant dense<0.000000e+00> : vector<8x96xf32>
    %175 = tpu.matmul %171, %174, %cst_67 {dimension_numbers = #tpu.dot_dimension_numbers<[1], [0], [0], [1], [0, 0, 1, 1], [], []>} : vector<8x32xf32>, vector<32x96xf32>, vector<8x96xf32> -> vector<8x96xf32>
    %c0_68 = arith.constant 0 : index
    %c0_69 = arith.constant 0 : index
    %176 = vector.load %arg4[%c0_68, %c0_69] : memref<1x96xf32, #tpu.memory_space<vmem>>, vector<1x96xf32>
    %177 = vector.broadcast %176 : vector<1x96xf32> to vector<8x96xf32>
    %178 = arith.addf %175, %177 : vector<8x96xf32>
    %179 = vector.extract_strided_slice %173 {offsets = [0, 0], sizes = [8, 32], strides = [1, 1]} : vector<8x96xf32> to vector<8x32xf32>
    %180 = vector.extract_strided_slice %178 {offsets = [0, 0], sizes = [8, 32], strides = [1, 1]} : vector<8x96xf32> to vector<8x32xf32>
    %181 = arith.addf %179, %180 : vector<8x32xf32>
    %182 = arith.negf %181 : vector<8x32xf32>
    %183 = math.exp %182 : vector<8x32xf32>
    %cst_70 = arith.constant 1.000000e+00 : f32
    %184 = vector.broadcast %cst_70 : f32 to vector<8x32xf32>
    %185 = arith.addf %184, %183 : vector<8x32xf32>
    %186 = arith.divf %184, %185 : vector<8x32xf32>
    %187 = vector.extract_strided_slice %173 {offsets = [0, 32], sizes = [8, 32], strides = [1, 1]} : vector<8x96xf32> to vector<8x32xf32>
    %188 = vector.extract_strided_slice %178 {offsets = [0, 32], sizes = [8, 32], strides = [1, 1]} : vector<8x96xf32> to vector<8x32xf32>
    %189 = arith.addf %187, %188 : vector<8x32xf32>
    %190 = arith.negf %189 : vector<8x32xf32>
    %191 = math.exp %190 : vector<8x32xf32>
    %cst_71 = arith.constant 1.000000e+00 : f32
    %192 = vector.broadcast %cst_71 : f32 to vector<8x32xf32>
    %193 = arith.addf %192, %191 : vector<8x32xf32>
    %194 = arith.divf %192, %193 : vector<8x32xf32>
    %195 = vector.extract_strided_slice %173 {offsets = [0, 64], sizes = [8, 32], strides = [1, 1]} : vector<8x96xf32> to vector<8x32xf32>
    %196 = vector.extract_strided_slice %178 {offsets = [0, 64], sizes = [8, 32], strides = [1, 1]} : vector<8x96xf32> to vector<8x32xf32>
    %197 = arith.mulf %186, %196 : vector<8x32xf32>
    %198 = arith.addf %195, %197 : vector<8x32xf32>
    %199 = math.tanh %198 : vector<8x32xf32>
    %cst_72 = arith.constant 1.000000e+00 : f32
    %200 = vector.broadcast %cst_72 : f32 to vector<8x32xf32>
    %201 = arith.subf %200, %194 : vector<8x32xf32>
    %202 = arith.mulf %201, %199 : vector<8x32xf32>
    %203 = arith.mulf %194, %171 : vector<8x32xf32>
    %204 = arith.addf %202, %203 : vector<8x32xf32>
    %c40_73 = arith.constant 40 : index
    %c0_74 = arith.constant 0 : index
    %205 = vector.load %arg9[%c40_73, %c0_74] : memref<64x32xf32, #tpu.memory_space<vmem>>, vector<8x32xf32>
    tpu.vector_store %arg9[%c40_73, %c0_74], %204 {strides = array<i32>} : memref<64x32xf32, #tpu.memory_space<vmem>>, vector<8x32xf32>,
    %c48 = arith.constant 48 : index
    %c0_75 = arith.constant 0 : index
    %206 = vector.load %arg8[%c48, %c0_75] : memref<64x96xf32, #tpu.memory_space<vmem>>, vector<8x96xf32>
    %c0_76 = arith.constant 0 : index
    %c0_77 = arith.constant 0 : index
    %207 = vector.load %arg2[%c0_76, %c0_77] : memref<32x96xf32, #tpu.memory_space<vmem>>, vector<32x96xf32>
    %cst_78 = arith.constant dense<0.000000e+00> : vector<8x96xf32>
    %208 = tpu.matmul %204, %207, %cst_78 {dimension_numbers = #tpu.dot_dimension_numbers<[1], [0], [0], [1], [0, 0, 1, 1], [], []>} : vector<8x32xf32>, vector<32x96xf32>, vector<8x96xf32> -> vector<8x96xf32>
    %c0_79 = arith.constant 0 : index
    %c0_80 = arith.constant 0 : index
    %209 = vector.load %arg4[%c0_79, %c0_80] : memref<1x96xf32, #tpu.memory_space<vmem>>, vector<1x96xf32>
    %210 = vector.broadcast %209 : vector<1x96xf32> to vector<8x96xf32>
    %211 = arith.addf %208, %210 : vector<8x96xf32>
    %212 = vector.extract_strided_slice %206 {offsets = [0, 0], sizes = [8, 32], strides = [1, 1]} : vector<8x96xf32> to vector<8x32xf32>
    %213 = vector.extract_strided_slice %211 {offsets = [0, 0], sizes = [8, 32], strides = [1, 1]} : vector<8x96xf32> to vector<8x32xf32>
    %214 = arith.addf %212, %213 : vector<8x32xf32>
    %215 = arith.negf %214 : vector<8x32xf32>
    %216 = math.exp %215 : vector<8x32xf32>
    %cst_81 = arith.constant 1.000000e+00 : f32
    %217 = vector.broadcast %cst_81 : f32 to vector<8x32xf32>
    %218 = arith.addf %217, %216 : vector<8x32xf32>
    %219 = arith.divf %217, %218 : vector<8x32xf32>
    %220 = vector.extract_strided_slice %206 {offsets = [0, 32], sizes = [8, 32], strides = [1, 1]} : vector<8x96xf32> to vector<8x32xf32>
    %221 = vector.extract_strided_slice %211 {offsets = [0, 32], sizes = [8, 32], strides = [1, 1]} : vector<8x96xf32> to vector<8x32xf32>
    %222 = arith.addf %220, %221 : vector<8x32xf32>
    %223 = arith.negf %222 : vector<8x32xf32>
    %224 = math.exp %223 : vector<8x32xf32>
    %cst_82 = arith.constant 1.000000e+00 : f32
    %225 = vector.broadcast %cst_82 : f32 to vector<8x32xf32>
    %226 = arith.addf %225, %224 : vector<8x32xf32>
    %227 = arith.divf %225, %226 : vector<8x32xf32>
    %228 = vector.extract_strided_slice %206 {offsets = [0, 64], sizes = [8, 32], strides = [1, 1]} : vector<8x96xf32> to vector<8x32xf32>
    %229 = vector.extract_strided_slice %211 {offsets = [0, 64], sizes = [8, 32], strides = [1, 1]} : vector<8x96xf32> to vector<8x32xf32>
    %230 = arith.mulf %219, %229 : vector<8x32xf32>
    %231 = arith.addf %228, %230 : vector<8x32xf32>
    %232 = math.tanh %231 : vector<8x32xf32>
    %cst_83 = arith.constant 1.000000e+00 : f32
    %233 = vector.broadcast %cst_83 : f32 to vector<8x32xf32>
    %234 = arith.subf %233, %227 : vector<8x32xf32>
    %235 = arith.mulf %234, %232 : vector<8x32xf32>
    %236 = arith.mulf %227, %204 : vector<8x32xf32>
    %237 = arith.addf %235, %236 : vector<8x32xf32>
    %c48_84 = arith.constant 48 : index
    %c0_85 = arith.constant 0 : index
    %238 = vector.load %arg9[%c48_84, %c0_85] : memref<64x32xf32, #tpu.memory_space<vmem>>, vector<8x32xf32>
    tpu.vector_store %arg9[%c48_84, %c0_85], %237 {strides = array<i32>} : memref<64x32xf32, #tpu.memory_space<vmem>>, vector<8x32xf32>,
    %c56 = arith.constant 56 : index
    %c0_86 = arith.constant 0 : index
    %239 = vector.load %arg8[%c56, %c0_86] : memref<64x96xf32, #tpu.memory_space<vmem>>, vector<8x96xf32>
    %c0_87 = arith.constant 0 : index
    %c0_88 = arith.constant 0 : index
    %240 = vector.load %arg2[%c0_87, %c0_88] : memref<32x96xf32, #tpu.memory_space<vmem>>, vector<32x96xf32>
    %cst_89 = arith.constant dense<0.000000e+00> : vector<8x96xf32>
    %241 = tpu.matmul %237, %240, %cst_89 {dimension_numbers = #tpu.dot_dimension_numbers<[1], [0], [0], [1], [0, 0, 1, 1], [], []>} : vector<8x32xf32>, vector<32x96xf32>, vector<8x96xf32> -> vector<8x96xf32>
    %c0_90 = arith.constant 0 : index
    %c0_91 = arith.constant 0 : index
    %242 = vector.load %arg4[%c0_90, %c0_91] : memref<1x96xf32, #tpu.memory_space<vmem>>, vector<1x96xf32>
    %243 = vector.broadcast %242 : vector<1x96xf32> to vector<8x96xf32>
    %244 = arith.addf %241, %243 : vector<8x96xf32>
    %245 = vector.extract_strided_slice %239 {offsets = [0, 0], sizes = [8, 32], strides = [1, 1]} : vector<8x96xf32> to vector<8x32xf32>
    %246 = vector.extract_strided_slice %244 {offsets = [0, 0], sizes = [8, 32], strides = [1, 1]} : vector<8x96xf32> to vector<8x32xf32>
    %247 = arith.addf %245, %246 : vector<8x32xf32>
    %248 = arith.negf %247 : vector<8x32xf32>
    %249 = math.exp %248 : vector<8x32xf32>
    %cst_92 = arith.constant 1.000000e+00 : f32
    %250 = vector.broadcast %cst_92 : f32 to vector<8x32xf32>
    %251 = arith.addf %250, %249 : vector<8x32xf32>
    %252 = arith.divf %250, %251 : vector<8x32xf32>
    %253 = vector.extract_strided_slice %239 {offsets = [0, 32], sizes = [8, 32], strides = [1, 1]} : vector<8x96xf32> to vector<8x32xf32>
    %254 = vector.extract_strided_slice %244 {offsets = [0, 32], sizes = [8, 32], strides = [1, 1]} : vector<8x96xf32> to vector<8x32xf32>
    %255 = arith.addf %253, %254 : vector<8x32xf32>
    %256 = arith.negf %255 : vector<8x32xf32>
    %257 = math.exp %256 : vector<8x32xf32>
    %cst_93 = arith.constant 1.000000e+00 : f32
    %258 = vector.broadcast %cst_93 : f32 to vector<8x32xf32>
    %259 = arith.addf %258, %257 : vector<8x32xf32>
    %260 = arith.divf %258, %259 : vector<8x32xf32>
    %261 = vector.extract_strided_slice %239 {offsets = [0, 64], sizes = [8, 32], strides = [1, 1]} : vector<8x96xf32> to vector<8x32xf32>
    %262 = vector.extract_strided_slice %244 {offsets = [0, 64], sizes = [8, 32], strides = [1, 1]} : vector<8x96xf32> to vector<8x32xf32>
    %263 = arith.mulf %252, %262 : vector<8x32xf32>
    %264 = arith.addf %261, %263 : vector<8x32xf32>
    %265 = math.tanh %264 : vector<8x32xf32>
    %cst_94 = arith.constant 1.000000e+00 : f32
    %266 = vector.broadcast %cst_94 : f32 to vector<8x32xf32>
    %267 = arith.subf %266, %260 : vector<8x32xf32>
    %268 = arith.mulf %267, %265 : vector<8x32xf32>
    %269 = arith.mulf %260, %237 : vector<8x32xf32>
    %270 = arith.addf %268, %269 : vector<8x32xf32>
    %c56_95 = arith.constant 56 : index
    %c0_96 = arith.constant 0 : index
    %271 = vector.load %arg9[%c56_95, %c0_96] : memref<64x32xf32, #tpu.memory_space<vmem>>, vector<8x32xf32>
    tpu.vector_store %arg9[%c56_95, %c0_96], %270 {strides = array<i32>} : memref<64x32xf32, #tpu.memory_space<vmem>>, vector<8x32xf32>,
    %c0_97 = arith.constant 0 : index
    %c0_98 = arith.constant 0 : index
    %272 = vector.load %arg9[%c0_97, %c0_98] : memref<64x32xf32, #tpu.memory_space<vmem>>, vector<64x32xf32>
    %c0_99 = arith.constant 0 : index
    %c0_100 = arith.constant 0 : index
    %273 = vector.load %arg5[%c0_99, %c0_100] : memref<32x1xf32, #tpu.memory_space<vmem>>, vector<32x1xf32>
    %cst_101 = arith.constant dense<0.000000e+00> : vector<64x1xf32>
    %274 = tpu.matmul %272, %273, %cst_101 {dimension_numbers = #tpu.dot_dimension_numbers<[1], [0], [0], [1], [0, 0, 1, 1], [], []>} : vector<64x32xf32>, vector<32x1xf32>, vector<64x1xf32> -> vector<64x1xf32>
    %c0_102 = arith.constant 0 : index
    %c0_103 = arith.constant 0 : index
    %275 = vector.load %arg6[%c0_102, %c0_103] : memref<1x1xf32, #tpu.memory_space<vmem>>, vector<1x1xf32>
    %276 = vector.broadcast %275 : vector<1x1xf32> to vector<64x1xf32>
    %277 = arith.addf %274, %276 : vector<64x1xf32>
    %278 = arith.negf %277 : vector<64x1xf32>
    %279 = math.exp %278 : vector<64x1xf32>
    %cst_104 = arith.constant 1.000000e+00 : f32
    %280 = vector.broadcast %cst_104 : f32 to vector<64x1xf32>
    %281 = arith.addf %280, %279 : vector<64x1xf32>
    %282 = arith.divf %280, %281 : vector<64x1xf32>
    %c0_105 = arith.constant 0 : index
    %c0_106 = arith.constant 0 : index
    %283 = vector.load %arg7[%c0_105, %c0_106] : memref<64x1xf32, #tpu.memory_space<vmem>>, vector<64x1xf32>
    tpu.vector_store %arg7[%c0_105, %c0_106], %282 {strides = array<i32>} : memref<64x1xf32, #tpu.memory_space<vmem>>, vector<64x1xf32>,
    return
  }
}

</mosaic_0001>

<bundles_post_ra>
// kernel: tpu_custom_call.1
= control target key start
LH: loop header
LB: loop body
LE: loop exit
PB: predicated region body
PF: predicated region fallthrough
CT: control target
= control target key end

     0   :  { %vm69_vm0 = vcmask 1044480   ;;  %vm44_vm1 = vcmask 39936   ;;  %v1694_v11 = vmov 0.0|0.0   ;;  %vm1695_vm2 = vmmov 0   ;;  %s1697_s24 = smov 64   ;;  %s1989_s1 = inlined_call_operand.vmem [shape: f32[5,96], index: 1, kind: input, shape index: {}]   ;;  %s1990_s0 = inlined_call_operand.vmem [shape: f32[64,5], index: 0, kind: input, shape index: {}]   ;;  %s1991_s2 = inlined_call_operand.vmem [shape: f32[32,96], index: 2, kind: input, shape index: {}]   ;;  %s1992_s3 = inlined_call_operand.vmem [shape: f32[1,96], index: 3, kind: input, shape index: {}]   ;;  %s1993_s4 = inlined_call_operand.vmem [shape: f32[1,96], index: 4, kind: input, shape index: {}]   ;;  %s1994_s5 = inlined_call_operand.vmem [shape: f32[32,1], index: 5, kind: input, shape index: {}]   ;;  %s1995_s6 = inlined_call_operand.<no memory space> [shape: f32[1,1], index: 6, kind: input, shape index: {}]   ;;  %s1996_s7 = inlined_call_operand.vmem [shape: f32[64,1], index: 7, kind: output, shape index: {}]  }
   0x1   :  { %v36_v0 = vld [vmem:[%s1989_s1] sm:$0x1f]  ;;  %v29_v3 = vld [vmem:[%s1990_s0 + $0x8] sm:$0xff]  ;;  %v34_v7 = vld [vmem:[%s1990_s0 + $0x30] sm:$0xff]  ;;  %v1696_v14 = vmov 0.0   ;;  %vm178_vm3 = vcmask 785408  }
   0x2   :  { %v28_v1 = vld [vmem:[%s1990_s0] sm:$0xff]  ;;  %1429 = vmatprep.subr.msk.mxu0 %vm69_vm0, %v36_v0  ;;  %1607 = vmatprep.subr.msk.mxu1 %vm69_vm0, %v36_v0  ;;  %v33_v4 = vld [vmem:[%s1990_s0 + $0x28] sm:$0xff]  ;;  %v190_v9 = vld [vmem:[%s1991_s2 + $0x10] sm:$0xff]  ;;  %vm199_vm4 = vcmask 261120   ;;  %vm1305_vm5 = vcmask 7168  }
   0x3   :  { %v32_v2 = vld [vmem:[%s1990_s0 + $0x20] sm:$0xff]  ;;  %1430 = vmatpush3.msk.msra.mxu0 %vm69_vm0, %v36_v0  ;;  %1608 = vmatpush3.msk.msra.mxu1 %vm69_vm0, %v36_v0  ;;  %v189_v6 = vld [vmem:[%s1991_s2 + $0x8] sm:$0xff]  ;;  %v191_v10 = vld [vmem:[%s1991_s2 + $0x18] sm:$0xff] }
   0x4   :  { %v188_v5 = vld [vmem:[%s1991_s2] sm:$0xff]  ;;  %1431 = vmatprep.mubr.msk.f32.mxu0 %vm44_vm1, %v28_v1  ;;  %1437 = vmatprep.mubr.msk.f32.mxu1 %vm44_vm1, %v32_v2  ;;  %v35_v12 = vld [vmem:[%s1990_s0 + $0x38] sm:$0xff]  ;;  %v1781_v13 = vpack.c.bf16 %v191_v10, %v190_v9  ;;  %v30_v62 = vld [vmem:[%s1990_s0 + $0x10] sm:$0xff] }
   0x5   :  { %v1765_v8 = vpack.c.bf16 %v189_v6, %v188_v5  ;;  %1432 = vmatmul.mubr.msk.f32.vlgmr.msra.gmra.mrb[0].mxu0 %vm44_vm1, %v29_v3  ;;  %1438 = vmatmul.mubr.msk.f32.vlgmr.msra.gmra.mrb[0].mxu1 %vm44_vm1, %v33_v4  ;;  %v1804_v15 = vld [vmem:[%s1992_s3] ss:$0 sm:$0xff]  ;;  %v31_v63 = vld [vmem:[%s1990_s0 + $0x18] sm:$0xff] }
   0x6   :  { %1551 = vmatprep.subr.bf16.mxu1 %v1694_v11  ;;  %1440 = vmatprep.mubr.msk.f32.mxu1 %vm44_vm1, %v34_v7  ;;  %v1820_v28 = vld [vmem:[%s1993_s4] ss:$0 sm:$0xff]  ;;  %s1698_s4 = smov 96  }
   0x7   :  { %1553 = vmatpush3.bf16.msra.mxu1 %v1765_v8  ;;  %1563 = vmatprep.subr.bf16.mxu0 %v1694_v11 }
   0x8   :  { %1554 = vmatprep.subr.bf16.mxu1 %v1694_v11  ;;  %1565 = vmatpush3.bf16.msra.mxu0 %v1765_v8 }
   0x9   :  { %1441 = vmatmul.mubr.msk.f32.gmra.mrb[2].mxu1 %vm44_vm1, %v35_v12  ;;  %1566 = vmatprep.subr.bf16.mxu0 %v1694_v11 }
   0xa   :  { %1451 = vmatprep.mubr.msk.f32.mxu1 %vm1695_vm2, %v1696_v14  ;;  %1434 = vmatprep.mubr.msk.f32.mxu0 %vm44_vm1, %v30_v62 }
   0xb   :  { %1556 = vmatpush3.bf16.msra.mxu1 %v1781_v13  ;;  %1435 = vmatmul.mubr.msk.f32.gmra.mrb[2].mxu0 %vm44_vm1, %v31_v63 }
   0xc   :  { %1557 = vmatprep.subr.bf16.mxu1 %v1694_v11  ;;  %1568 = vmatpush3.bf16.msra.mxu0 %v1781_v13 }
   0xd   :  { %1575 = vmatprep.subr.bf16.mxu0 %v1694_v11  ;;  %1473 = vmatprep.mubr.msk.f32.mxu0 %vm1695_vm2, %v1696_v14 }
   0xe   :  { %1452 = vmatmul.mubr.f32.vlgmr.msra.gmra.mrb[4].mxu1 %v1696_v14 }
   0xf   :  { %1559 = vmatpush3.bf16.msra.mxu1 %v1765_v8  ;;  %1462 = vmatprep.mubr.msk.f32.mxu1 %vm1695_vm2, %v1696_v14 }
  0x10   :  { %1560 = vmatprep.subr.bf16.mxu1 %v1694_v11 }
  0x13   :  { %1562 = vmatpush3.bf16.msra.mxu1 %v1781_v13 }
  0x14   :  { %1569 = vmatprep.subr.bf16.mxu1 %v1694_v11 }
  0xd8   :  { %v1433_v16 = vpop.f32.mrb[0].mxu0  ;;  %v1439_v17 = vpop.f32.mrb[0].mxu1 }
  0xd9   :  { %v145_v18 = vadd.f32 %v1433_v16, %v1804_v15  ;;  %v165_v19 = vadd.f32 %v1439_v17, %v1804_v15  ;;  %v139_v20 = vpop.f32.mrb[1].mxu0  ;;  %v159_v21 = vpop.f32.mrb[1].mxu1 }
  0xda   :  { %v140_v22 = vadd.f32 %v1804_v15, %v139_v20  ;;  %v160_v23 = vadd.f32 %v1804_v15, %v159_v21 }
  0xdb   :  { %180 = vst.msk [vmem:[#allocation2 + $0x8] sm:$0xff] %vm178_vm3, %v145_v18  ;;  %184 = vst.msk [vmem:[#allocation2 + $0x28] sm:$0xff] %vm178_vm3, %v165_v19 }
  0xdc   :  { %179 = vst.msk [vmem:[#allocation2] sm:$0xff] %vm178_vm3, %v140_v22  ;;  %183 = vst.msk [vmem:[#allocation2 + $0x20] sm:$0xff] %vm178_vm3, %v160_v23  ;;  %v1442_v24 = vpop.f32.mrb[2].mxu1 }
  0xdd   :  { %v175_v25 = vadd.f32 %v1442_v24, %v1804_v15  ;;  %v169_v26 = vpop.f32.mrb[3].mxu1 }
  0xde   :  { %v170_v27 = vadd.f32 %v1804_v15, %v169_v26  ;;  %v1436_v6 = vpop.f32.mrb[2].mxu0 }
  0xdf   :  { %186 = vst.msk [vmem:[#allocation2 + $0x38] sm:$0xff] %vm178_vm3, %v175_v25  ;;  %v155_v7 = vadd.f32 %v1436_v6, %v1804_v15  ;;  %v149_v9 = vpop.f32.mrb[3].mxu0 }
  0xe0   :  { %185 = vst.msk [vmem:[#allocation2 + $0x30] sm:$0xff] %vm178_vm3, %v170_v27  ;;  %v150_v10 = vadd.f32 %v1804_v15, %v149_v9 }
  0xe1   :  { %v269_v29 = vpop.f32.mrb[4].mxu1  ;;  %182 = vst.msk [vmem:[#allocation2 + $0x18] sm:$0xff] %vm178_vm3, %v155_v7 }
  0xe2   :  { %v270_v30 = vadd.f32 %v1820_v28, %v269_v29  ;;  %v1453_v31 = vpop.f32.mrb[5].mxu1  ;;  %v304_v52 = vld [vmem:[#allocation2 + $0x8] sm:$0xff]  ;;  %181 = vst.msk [vmem:[#allocation2 + $0x10] sm:$0xff] %vm178_vm3, %v150_v10 }
  0xe3   :  { %v187_v32 = vld [vmem:[#allocation2] sm:$0xff] }
  0xe4   :  { %281 = vrot.lane.b32.xlu0 %v270_v30, %s1697_s24  ;;  %v273_v33 = vadd.f32 %v270_v30, %v187_v32 }
  0xe6   :  { %v1329_v34 = vmul.f32 -1.442695, %v273_v33 }
  0xe8   :  { %1614 = vpow2.f32 %v1329_v34 }
  0xe9   :  { %v419_v18 = vld [vmem:[#allocation2 + $0x10] sm:$0xff] }
  0xf2   :  { %v1615_v35 = vpop.eup %1614 }
  0xf3   :  { %v277_v36 = vadd.f32 1.0, %v1615_v35 }
  0xf5   :  { %1616 = vrcp.f32 %v277_v36 }
  0xff   :  { %v1617_v37 = vpop.eup %1616 }
 0x100   :  { %v291_v43 = vsub.f32 1.0, %v1617_v37  ;;  %v297_v45 = vmul.f32 0.0, %v1617_v37 }
 0x156   :  { %v282_v38 = vpop.permute.xlu0 %281 }
 0x157   :  { %v284_v39 = vmul.f32 %v1617_v37, %v282_v38 }
 0x159   :  { %286 = vrot.lane.b32.xlu0 %v284_v39, %s1697_s24  ;;  %v534_v39 = vld [vmem:[#allocation2 + $0x18] sm:$0xff] }
 0x1cb   :  { %v287_v40 = vpop.permute.xlu0 %286 }
 0x1cc   :  { %v289_v41 = vadd.f32 %v287_v40, %v187_v32 }
 0x1ce   :  { %1618 = vtanh.f32 %v289_v41 }
 0x1d8   :  { %v1619_v42 = vpop.eup %1618 }
 0x1d9   :  { %293 = vrot.lane.b32.xlu1 %v1619_v42, %s1698_s4 }
 0x24b   :  { %v294_v44 = vpop.permute.xlu1 %293 }
 0x24c   :  { %v296_v46 = vmul.f32 %v294_v44, %v291_v43 }
 0x24e   :  { %v298_v47 = vadd.f32 %v297_v45, %v296_v46 }
 0x250   :  { %300 = vrot.lane.b32.xlu1 %v298_v47, %s1698_s4 }
 0x2c2   :  { %v301_v48 = vpop.permute.xlu1 %300 }
 0x2c3   :  { %303 = vst.msk [vmem:[#allocation3] sm:$0xff] %vm199_vm4, %v301_v48  ;;  %1463 = vmatmul.mubr.msk.f32.vlgmr.msra.gmra.mrb[6].mxu1 %vm199_vm4, %v301_v48 }
 0x2c4   :  { %1571 = vmatpush3.bf16.msra.mxu1 %v1765_v8  ;;  %1484 = vmatprep.mubr.msk.f32.mxu1 %vm1695_vm2, %v1696_v14 }
 0x2c5   :  { %1572 = vmatprep.subr.bf16.mxu1 %v1694_v11 }
 0x2c8   :  { %1574 = vmatpush3.bf16.msra.mxu1 %v1781_v13 }
 0x2c9   :  { %1581 = vmatprep.subr.bf16.mxu1 %v1694_v11 }
 0x396   :  { %v384_v49 = vpop.f32.mrb[6].mxu1 }
 0x397   :  { %v385_v50 = vadd.f32 %v1820_v28, %v384_v49  ;;  %v1464_v51 = vpop.f32.mrb[7].mxu1 }
 0x399   :  { %396 = vrot.lane.b32.xlu0 %v385_v50, %s1697_s24  ;;  %v388_v53 = vadd.f32 %v385_v50, %v304_v52 }
 0x39b   :  { %v1332_v54 = vmul.f32 -1.442695, %v388_v53 }
 0x39d   :  { %1620 = vpow2.f32 %v1332_v54 }
 0x3a7   :  { %v1621_v55 = vpop.eup %1620 }
 0x3a8   :  { %v392_v56 = vadd.f32 1.0, %v1621_v55 }
 0x3aa   :  { %1622 = vrcp.f32 %v392_v56 }
 0x3b4   :  { %v1623_v57 = vpop.eup %1622 }
 0x3b5   :  { %v406_v1 = vsub.f32 1.0, %v1623_v57  ;;  %v412_v3 = vmul.f32 %v1623_v57, %v298_v47 }
 0x40b   :  { %v397_v58 = vpop.permute.xlu0 %396 }
 0x40c   :  { %v399_v59 = vmul.f32 %v1623_v57, %v397_v58 }
 0x40e   :  { %401 = vrot.lane.b32.xlu1 %v399_v59, %s1697_s24  ;;  %v649_v59 = vld [vmem:[#allocation2 + $0x20] sm:$0xff] }
 0x480   :  { %v402_v60 = vpop.permute.xlu1 %401 }
 0x481   :  { %v404_v61 = vadd.f32 %v402_v60, %v304_v52 }
 0x483   :  { %1624 = vtanh.f32 %v404_v61 }
 0x48d   :  { %v1625_v0 = vpop.eup %1624 }
 0x48e   :  { %408 = vrot.lane.b32.xlu0 %v1625_v0, %s1698_s4 }
 0x500   :  { %v409_v2 = vpop.permute.xlu0 %408 }
 0x501   :  { %v411_v4 = vmul.f32 %v409_v2, %v406_v1 }
 0x503   :  { %v413_v5 = vadd.f32 %v412_v3, %v411_v4 }
 0x505   :  { %415 = vrot.lane.b32.xlu1 %v413_v5, %s1698_s4 }
 0x577   :  { %v416_v12 = vpop.permute.xlu1 %415 }
 0x578   :  { %418 = vst.msk [vmem:[#allocation3 + $0x8] sm:$0xff] %vm199_vm4, %v416_v12  ;;  %1474 = vmatmul.mubr.msk.f32.vlgmr.msra.gmra.mrb[4].mxu0 %vm199_vm4, %v416_v12 }
 0x579   :  { %1577 = vmatpush3.bf16.msra.mxu0 %v1765_v8  ;;  %1495 = vmatprep.mubr.msk.f32.mxu0 %vm1695_vm2, %v1696_v14 }
 0x57a   :  { %1578 = vmatprep.subr.bf16.mxu0 %v1694_v11 }
 0x57d   :  { %1580 = vmatpush3.bf16.msra.mxu0 %v1781_v13 }
 0x57e   :  { %1587 = vmatprep.subr.bf16.mxu0 %v1694_v11 }
 0x64b   :  { %v499_v15 = vpop.f32.mrb[4].mxu0 }
 0x64c   :  { %v500_v16 = vadd.f32 %v1820_v28, %v499_v15  ;;  %v1475_v17 = vpop.f32.mrb[5].mxu0 }
 0x64e   :  { %511 = vrot.lane.b32.xlu0 %v500_v16, %s1697_s24  ;;  %v503_v19 = vadd.f32 %v500_v16, %v419_v18 }
 0x650   :  { %v1335_v20 = vmul.f32 -1.442695, %v503_v19  ;;  %v764_v19 = vld [vmem:[#allocation2 + $0x28] sm:$0xff] }
 0x652   :  { %1626 = vpow2.f32 %v1335_v20 }
 0x65c   :  { %v1627_v21 = vpop.eup %1626 }
 0x65d   :  { %v507_v22 = vadd.f32 1.0, %v1627_v21 }
 0x65f   :  { %1628 = vrcp.f32 %v507_v22 }
 0x669   :  { %v1629_v23 = vpop.eup %1628 }
 0x66a   :  { %v521_v30 = vsub.f32 1.0, %v1629_v23  ;;  %v527_v32 = vmul.f32 %v1629_v23, %v413_v5 }
 0x6c0   :  { %v512_v24 = vpop.permute.xlu0 %511 }
 0x6c1   :  { %v514_v25 = vmul.f32 %v1629_v23, %v512_v24 }
 0x6c3   :  { %516 = vrot.lane.b32.xlu1 %v514_v25, %s1697_s24  ;;  %v1117_v25 = vld [vmem:[%s1994_s5] sm:$0xff] }
 0x735   :  { %v517_v26 = vpop.permute.xlu1 %516 }
 0x736   :  { %v519_v27 = vadd.f32 %v517_v26, %v419_v18  ;;  %v1118_v26 = vld [vmem:[%s1994_s5 + $0x8] sm:$0xff] }
 0x738   :  { %1630 = vtanh.f32 %v519_v27  ;;  %v1599_v27 = vpack.c.bf16 %v1118_v26, %v1117_v25 }
 0x742   :  { %v1631_v29 = vpop.eup %1630 }
 0x743   :  { %523 = vrot.lane.b32.xlu0 %v1631_v29, %s1698_s4 }
 0x7b5   :  { %v524_v31 = vpop.permute.xlu0 %523 }
 0x7b6   :  { %v526_v33 = vmul.f32 %v524_v31, %v521_v30 }
 0x7b8   :  { %v528_v34 = vadd.f32 %v527_v32, %v526_v33 }
 0x7ba   :  { %530 = vrot.lane.b32.xlu1 %v528_v34, %s1698_s4 }
 0x82c   :  { %v531_v35 = vpop.permute.xlu1 %530 }
 0x82d   :  { %533 = vst.msk [vmem:[#allocation3 + $0x10] sm:$0xff] %vm199_vm4, %v531_v35  ;;  %1485 = vmatmul.mubr.msk.f32.vlgmr.msra.gmra.mrb[8].mxu1 %vm199_vm4, %v531_v35  ;;  %v1119_v35 = vld [vmem:[%s1994_s5 + $0x10] sm:$0xff] }
 0x82e   :  { %1583 = vmatpush3.bf16.msra.mxu1 %v1765_v8  ;;  %1506 = vmatprep.mubr.msk.f32.mxu1 %vm1695_vm2, %v1696_v14 }
 0x82f   :  { %1584 = vmatprep.subr.bf16.mxu1 %v1694_v11 }
 0x832   :  { %1586 = vmatpush3.bf16.msra.mxu1 %v1781_v13 }
 0x833   :  { %1593 = vmatprep.subr.bf16.mxu1 %v1694_v11 }
 0x900   :  { %v614_v36 = vpop.f32.mrb[8].mxu1 }
 0x901   :  { %v615_v37 = vadd.f32 %v1820_v28, %v614_v36  ;;  %v1486_v38 = vpop.f32.mrb[9].mxu1  ;;  %v1120_v36 = vld [vmem:[%s1994_s5 + $0x18] sm:$0xff] }
 0x903   :  { %626 = vrot.lane.b32.xlu0 %v615_v37, %s1697_s24  ;;  %v618_v40 = vadd.f32 %v615_v37, %v534_v39  ;;  %v1603_v37 = vpack.c.bf16 %v1120_v36, %v1119_v35 }
 0x905   :  { %v1338_v41 = vmul.f32 -1.442695, %v618_v40  ;;  %v1110_v40 = vld [vmem:[#allocation3 + $0x8] sm:$0xff] }
 0x907   :  { %1632 = vpow2.f32 %v1338_v41  ;;  %v1111_v41 = vld [vmem:[#allocation3 + $0x10] sm:$0xff] }
 0x911   :  { %v1633_v42 = vpop.eup %1632 }
 0x912   :  { %v622_v43 = vadd.f32 1.0, %v1633_v42 }
 0x914   :  { %1634 = vrcp.f32 %v622_v43 }
 0x91e   :  { %v1635_v44 = vpop.eup %1634 }
 0x91f   :  { %v636_v50 = vsub.f32 1.0, %v1635_v44  ;;  %v642_v52 = vmul.f32 %v1635_v44, %v528_v34 }
 0x975   :  { %v627_v45 = vpop.permute.xlu0 %626 }
 0x976   :  { %v629_v46 = vmul.f32 %v1635_v44, %v627_v45  ;;  %v12_v45 = vstv %s1995_s6 }
 0x977   :  { %13 = vst [vmem:[#allocation4] sm:$0x1] %v12_v45  ;;  %v994_v45 = vld [vmem:[#allocation2 + $0x38] sm:$0xff] }
 0x978   :  { %631 = vrot.lane.b32.xlu1 %v629_v46, %s1697_s24 }
 0x9ea   :  { %v632_v47 = vpop.permute.xlu1 %631 }
 0x9eb   :  { %v634_v48 = vadd.f32 %v632_v47, %v534_v39  ;;  %v1109_v39 = vld [vmem:[#allocation3] sm:$0xff] }
 0x9ed   :  { %1636 = vtanh.f32 %v634_v48 }
 0x9f7   :  { %v1637_v49 = vpop.eup %1636 }
 0x9f8   :  { %638 = vrot.lane.b32.xlu0 %v1637_v49, %s1698_s4  ;;  %v1933_v49 = vld [vmem:[#allocation4] ss:$0 sm:$0xff] }
 0xa6a   :  { %v639_v51 = vpop.permute.xlu0 %638 }
 0xa6b   :  { %v641_v53 = vmul.f32 %v639_v51, %v636_v50 }
 0xa6d   :  { %v643_v54 = vadd.f32 %v642_v52, %v641_v53 }
 0xa6f   :  { %645 = vrot.lane.b32.xlu1 %v643_v54, %s1698_s4 }
 0xae1   :  { %v646_v55 = vpop.permute.xlu1 %645 }
 0xae2   :  { %648 = vst.msk [vmem:[#allocation3 + $0x18] sm:$0xff] %vm199_vm4, %v646_v55  ;;  %1496 = vmatmul.mubr.msk.f32.vlgmr.msra.gmra.mrb[6].mxu0 %vm199_vm4, %v646_v55 }
 0xae3   :  { %1589 = vmatpush3.bf16.msra.mxu0 %v1765_v8  ;;  %1517 = vmatprep.mubr.msk.f32.mxu0 %vm1695_vm2, %v1696_v14 }
 0xae4   :  { %1590 = vmatprep.subr.bf16.mxu0 %v1694_v11 }
 0xae7   :  { %1592 = vmatpush3.bf16.msra.mxu0 %v1781_v13 }
 0xae8   :  { %1600 = vmatprep.subr.bf16.mxu0 %v1599_v27 }
 0xae9   :  { %v1112_v42 = vld [vmem:[#allocation3 + $0x18] sm:$0xff] }
 0xbb5   :  { %v729_v56 = vpop.f32.mrb[6].mxu0 }
 0xbb6   :  { %v730_v57 = vadd.f32 %v1820_v28, %v729_v56  ;;  %v1497_v58 = vpop.f32.mrb[7].mxu0 }
 0xbb8   :  { %741 = vrot.lane.b32.xlu0 %v730_v57, %s1697_s24  ;;  %v733_v60 = vadd.f32 %v730_v57, %v649_v59 }
 0xbba   :  { %v1341_v61 = vmul.f32 -1.442695, %v733_v60 }
 0xbbc   :  { %1638 = vpow2.f32 %v1341_v61 }
 0xbc6   :  { %v1639_v62 = vpop.eup %1638 }
 0xbc7   :  { %v737_v63 = vadd.f32 1.0, %v1639_v62 }
 0xbc9   :  { %1640 = vrcp.f32 %v737_v63 }
 0xbd3   :  { %v1641_v0 = vpop.eup %1640 }
 0xbd4   :  { %v751_v6 = vsub.f32 1.0, %v1641_v0  ;;  %v757_v9 = vmul.f32 %v1641_v0, %v643_v54 }
 0xc2a   :  { %v742_v1 = vpop.permute.xlu0 %741 }
 0xc2b   :  { %v744_v2 = vmul.f32 %v1641_v0, %v742_v1 }
 0xc2d   :  { %746 = vrot.lane.b32.xlu1 %v744_v2, %s1697_s24 }
 0xc9f   :  { %v747_v3 = vpop.permute.xlu1 %746 }
 0xca0   :  { %v749_v4 = vadd.f32 %v747_v3, %v649_v59 }
 0xca2   :  { %1642 = vtanh.f32 %v749_v4 }
 0xcac   :  { %v1643_v5 = vpop.eup %1642 }
 0xcad   :  { %753 = vrot.lane.b32.xlu0 %v1643_v5, %s1698_s4 }
 0xd1f   :  { %v754_v7 = vpop.permute.xlu0 %753 }
 0xd20   :  { %v756_v10 = vmul.f32 %v754_v7, %v751_v6 }
 0xd22   :  { %v758_v12 = vadd.f32 %v757_v9, %v756_v10 }
 0xd24   :  { %760 = vrot.lane.b32.xlu1 %v758_v12, %s1698_s4 }
 0xd96   :  { %v761_v15 = vpop.permute.xlu1 %760 }
 0xd97   :  { %763 = vst.msk [vmem:[#allocation3 + $0x20] sm:$0xff] %vm199_vm4, %v761_v15  ;;  %1507 = vmatmul.mubr.msk.f32.vlgmr.msra.gmra.mrb[10].mxu1 %vm199_vm4, %v761_v15 }
 0xd98   :  { %1595 = vmatpush3.bf16.msra.mxu1 %v1765_v8  ;;  %1528 = vmatprep.mubr.msk.f32.mxu1 %vm1695_vm2, %v1696_v14 }
 0xd99   :  { %1596 = vmatprep.subr.bf16.mxu1 %v1694_v11 }
 0xd9c   :  { %1598 = vmatpush3.bf16.msra.mxu1 %v1781_v13 }
 0xd9e   :  { %v1113_v43 = vld [vmem:[#allocation3 + $0x20] sm:$0xff] }
 0xe6a   :  { %v844_v16 = vpop.f32.mrb[10].mxu1 }
 0xe6b   :  { %v845_v17 = vadd.f32 %v1820_v28, %v844_v16  ;;  %v1508_v18 = vpop.f32.mrb[11].mxu1 }
 0xe6d   :  { %856 = vrot.lane.b32.xlu0 %v845_v17, %s1697_s24  ;;  %v848_v20 = vadd.f32 %v845_v17, %v764_v19 }
 0xe6f   :  { %v1344_v21 = vmul.f32 -1.442695, %v848_v20 }
 0xe71   :  { %1644 = vpow2.f32 %v1344_v21 }
 0xe7b   :  { %v1645_v22 = vpop.eup %1644 }
 0xe7c   :  { %v852_v23 = vadd.f32 1.0, %v1645_v22 }
 0xe7e   :  { %1646 = vrcp.f32 %v852_v23 }
 0xe88   :  { %v1647_v8 = vpop.eup %1646 }
 0xe89   :  { %v866_v30 = vsub.f32 1.0, %v1647_v8  ;;  %v872_v32 = vmul.f32 %v1647_v8, %v758_v12 }
 0xedf   :  { %v857_v24 = vpop.permute.xlu0 %856 }
 0xee0   :  { %v859_v14 = vmul.f32 %v1647_v8, %v857_v24 }
 0xee2   :  { %861 = vrot.lane.b32.xlu1 %v859_v14, %s1697_s24  ;;  %v879_v14 = vld [vmem:[#allocation2 + $0x30] sm:$0xff] }
 0xf54   :  { %v862_v11 = vpop.permute.xlu1 %861 }
 0xf55   :  { %v864_v13 = vadd.f32 %v862_v11, %v764_v19 }
 0xf57   :  { %1648 = vtanh.f32 %v864_v13 }
 0xf61   :  { %v1649_v29 = vpop.eup %1648 }
 0xf62   :  { %868 = vrot.lane.b32.xlu0 %v1649_v29, %s1698_s4 }
 0xfd4   :  { %v869_v31 = vpop.permute.xlu0 %868 }
 0xfd5   :  { %v871_v33 = vmul.f32 %v869_v31, %v866_v30 }
 0xfd7   :  { %v1910_v34 = vadd.f32 %v872_v32, %v871_v33 }
 0xfd9   :  { %875 = vrot.lane.b32.xlu1 %v1910_v34, %s1698_s4 }
0x104b   :  { %v876_v38 = vpop.permute.xlu1 %875 }
0x104c   :  { %878 = vst.msk [vmem:[#allocation3 + $0x28] sm:$0xff] %vm199_vm4, %v876_v38  ;;  %1518 = vmatmul.mubr.msk.f32.vlgmr.msra.gmra.mrb[8].mxu0 %vm199_vm4, %v876_v38 }
0x104d   :  { %1602 = vmatpush3.bf16.msra.mxu0 %v1599_v27  ;;  %1539 = vmatprep.mubr.msk.f32.mxu0 %vm199_vm4, %v1109_v39 }
0x104e   :  { %1604 = vmatprep.subr.bf16.mxu0 %v1603_v37 }
0x1051   :  { %1606 = vmatpush3.bf16.msra.mxu0 %v1603_v37 }
0x1053   :  { %v1114_v44 = vld [vmem:[#allocation3 + $0x28] sm:$0xff] }
0x1054   :  { %1540 = vmatmul.mubr.msk.f32.vlgmr.msra.gmra.mrb[10].mxu0 %vm199_vm4, %v1110_v40 }
0x1055   :  { %1542 = vmatprep.mubr.msk.f32.mxu0 %vm199_vm4, %v1111_v41 }
0x1058   :  { %1543 = vmatmul.mubr.msk.f32.gmra.mrb[12].mxu0 %vm199_vm4, %v1112_v42 }
0x1059   :  { %1545 = vmatprep.mubr.msk.f32.mxu0 %vm199_vm4, %v1113_v43 }
0x105c   :  { %1546 = vmatmul.mubr.msk.f32.gmra.mrb[14].mxu0 %vm199_vm4, %v1114_v44 }
0x111f   :  { %v959_v46 = vpop.f32.mrb[8].mxu0 }
0x1120   :  { %v960_v47 = vadd.f32 %v1820_v28, %v959_v46  ;;  %v1519_v48 = vpop.f32.mrb[9].mxu0 }
0x1122   :  { %971 = vrot.lane.b32.xlu0 %v960_v47, %s1697_s24  ;;  %v963_v11 = vadd.f32 %v960_v47, %v879_v14 }
0x1124   :  { %v1347_v13 = vmul.f32 -1.442695, %v963_v11 }
0x1127   :  { %v1541_v50 = vpop.f32.mrb[10].mxu0 }
0x1128   :  { %v1224_v51 = vadd.f32 %v1541_v50, %v1933_v49  ;;  %v1218_v52 = vpop.f32.mrb[11].mxu0 }
0x1129   :  { %v1219_v53 = vadd.f32 %v1933_v49, %v1218_v52 }
0x112a   :  { %v1361_v54 = vmul.f32 -1.442695, %v1224_v51 }
0x112b   :  { %v1360_v55 = vmul.f32 -1.442695, %v1219_v53  ;;  %v1544_v56 = vpop.f32.mrb[12].mxu0 }
0x112c   :  { %1650 = vpow2.f32 %v1361_v54  ;;  %v1234_v57 = vadd.f32 %v1544_v56, %v1933_v49  ;;  %v1228_v58 = vpop.f32.mrb[13].mxu0 }
0x112d   :  { %1652 = vpow2.f32 %v1360_v55  ;;  %v1229_v59 = vadd.f32 %v1933_v49, %v1228_v58 }
0x112e   :  { %v1363_v60 = vmul.f32 -1.442695, %v1234_v57 }
0x112f   :  { %v1362_v61 = vmul.f32 -1.442695, %v1229_v59  ;;  %v1547_v62 = vpop.f32.mrb[14].mxu0 }
0x1130   :  { %1654 = vpow2.f32 %v1363_v60  ;;  %v1244_v63 = vadd.f32 %v1547_v62, %v1933_v49  ;;  %v1238_v0 = vpop.f32.mrb[15].mxu0 }
0x1131   :  { %1656 = vpow2.f32 %v1362_v61  ;;  %v1239_v1 = vadd.f32 %v1933_v49, %v1238_v0 }
0x1132   :  { %v1365_v2 = vmul.f32 -1.442695, %v1244_v63 }
0x1133   :  { %v1364_v3 = vmul.f32 -1.442695, %v1239_v1 }
0x1134   :  { %1658 = vpow2.f32 %v1365_v2 }
0x1135   :  { %1660 = vpow2.f32 %v1364_v3 }
0x1136   :  { %v1651_v4 = vpop.eup %1650 }
0x1137   :  { %v1653_v5 = vpop.eup %1652  ;;  %v1282_v6 = vadd.f32 1.0, %v1651_v4 }
0x1138   :  { %v1281_v7 = vadd.f32 1.0, %v1653_v5 }
0x1139   :  { %1662 = vrcp.f32 %v1282_v6 }
0x113a   :  { %v1655_v9 = vpop.eup %1654  ;;  %1664 = vrcp.f32 %v1281_v7 }
0x113b   :  { %v1657_v10 = vpop.eup %1656  ;;  %v1284_v12 = vadd.f32 1.0, %v1655_v9 }
0x113c   :  { %v1283_v15 = vadd.f32 1.0, %v1657_v10 }
0x113d   :  { %1666 = vrcp.f32 %v1284_v12 }
0x113e   :  { %v1659_v16 = vpop.eup %1658  ;;  %1668 = vrcp.f32 %v1283_v15 }
0x113f   :  { %v1661_v17 = vpop.eup %1660  ;;  %v1286_v18 = vadd.f32 1.0, %v1659_v16 }
0x1140   :  { %v1285_v19 = vadd.f32 1.0, %v1661_v17 }
0x1141   :  { %1670 = vrcp.f32 %v1286_v18 }
0x1142   :  { %1672 = vrcp.f32 %v1285_v19 }
0x1143   :  { %v1663_v20 = vpop.eup %1662  ;;  %1674 = vpow2.f32 %v1347_v13 }
0x1144   :  { %v1665_v21 = vpop.eup %1664  ;;  %1307 = vst.msk [vmem:[%s1996_s7 + $0x8] sm:$0xff] %vm1305_vm5, %v1663_v20 }
0x1145   :  { %1306 = vst.msk [vmem:[%s1996_s7] sm:$0xff] %vm1305_vm5, %v1665_v21 }
0x1147   :  { %v1667_v22 = vpop.eup %1666 }
0x1148   :  { %v1669_v23 = vpop.eup %1668  ;;  %1309 = vst.msk [vmem:[%s1996_s7 + $0x18] sm:$0xff] %vm1305_vm5, %v1667_v22 }
0x1149   :  { %1308 = vst.msk [vmem:[%s1996_s7 + $0x10] sm:$0xff] %vm1305_vm5, %v1669_v23 }
0x114b   :  { %v1671_v8 = vpop.eup %1670 }
0x114c   :  { %v1673_v24 = vpop.eup %1672  ;;  %1311 = vst.msk [vmem:[%s1996_s7 + $0x28] sm:$0xff] %vm1305_vm5, %v1671_v8 }
0x114d   :  { %1310 = vst.msk [vmem:[%s1996_s7 + $0x20] sm:$0xff] %vm1305_vm5, %v1673_v24  ;;  %v1675_v25 = vpop.eup %1674 }
0x114e   :  { %v967_v26 = vadd.f32 1.0, %v1675_v25 }
0x1150   :  { %1676 = vrcp.f32 %v967_v26 }
0x115a   :  { %v1677_v27 = vpop.eup %1676 }
0x115b   :  { %v981_v35 = vsub.f32 1.0, %v1677_v27  ;;  %v987_v37 = vmul.f32 %v1677_v27, %v1910_v34 }
0x1194   :  { %v972_v29 = vpop.permute.xlu0 %971 }
0x1195   :  { %v974_v30 = vmul.f32 %v1677_v27, %v972_v29 }
0x1197   :  { %976 = vrot.lane.b32.xlu1 %v974_v30, %s1697_s24 }
0x1209   :  { %v977_v31 = vpop.permute.xlu1 %976 }
0x120a   :  { %v979_v32 = vadd.f32 %v977_v31, %v879_v14 }
0x120c   :  { %1678 = vtanh.f32 %v979_v32 }
0x1216   :  { %v1679_v33 = vpop.eup %1678 }
0x1217   :  { %983 = vrot.lane.b32.xlu0 %v1679_v33, %s1698_s4 }
0x1289   :  { %v984_v36 = vpop.permute.xlu0 %983 }
0x128a   :  { %v986_v38 = vmul.f32 %v984_v36, %v981_v35 }
0x128c   :  { %v988_v39 = vadd.f32 %v987_v37, %v986_v38 }
0x128e   :  { %990 = vrot.lane.b32.xlu1 %v988_v39, %s1698_s4 }
0x1300   :  { %v991_v40 = vpop.permute.xlu1 %990 }
0x1301   :  { %993 = vst.msk [vmem:[#allocation3 + $0x30] sm:$0xff] %vm199_vm4, %v991_v40  ;;  %1529 = vmatmul.mubr.msk.f32.vlgmr.msra.gmra.mrb[12].mxu1 %vm199_vm4, %v991_v40 }
0x1308   :  { %v1115_v41 = vld [vmem:[#allocation3 + $0x30] sm:$0xff] }
0x1309   :  { %1548 = vmatprep.mubr.msk.f32.mxu0 %vm199_vm4, %v1115_v41 }
0x13d4   :  { %v1074_v42 = vpop.f32.mrb[12].mxu1 }
0x13d5   :  { %v1075_v43 = vadd.f32 %v1820_v28, %v1074_v42  ;;  %v1530_v44 = vpop.f32.mrb[13].mxu1 }
0x13d7   :  { %1086 = vrot.lane.b32.xlu0 %v1075_v43, %s1697_s24  ;;  %v1078_v34 = vadd.f32 %v1075_v43, %v994_v45 }
0x13d9   :  { %v1350_v46 = vmul.f32 -1.442695, %v1078_v34 }
0x13db   :  { %1680 = vpow2.f32 %v1350_v46 }
0x13e5   :  { %v1681_v47 = vpop.eup %1680 }
0x13e6   :  { %v1082_v48 = vadd.f32 1.0, %v1681_v47 }
0x13e8   :  { %1682 = vrcp.f32 %v1082_v48 }
0x13f2   :  { %v1683_v50 = vpop.eup %1682 }
0x13f3   :  { %v1096_v28 = vsub.f32 1.0, %v1683_v50  ;;  %v1102_v57 = vmul.f32 %v1683_v50, %v988_v39 }
0x1449   :  { %v1087_v51 = vpop.permute.xlu0 %1086 }
0x144a   :  { %v1089_v52 = vmul.f32 %v1683_v50, %v1087_v51 }
0x144c   :  { %1091 = vrot.lane.b32.xlu1 %v1089_v52, %s1697_s24 }
0x14be   :  { %v1092_v53 = vpop.permute.xlu1 %1091 }
0x14bf   :  { %v1094_v54 = vadd.f32 %v1092_v53, %v994_v45 }
0x14c1   :  { %1684 = vtanh.f32 %v1094_v54 }
0x14cb   :  { %v1685_v55 = vpop.eup %1684 }
0x14cc   :  { %1098 = vrot.lane.b32.xlu0 %v1685_v55, %s1698_s4 }
0x153e   :  { %v1099_v56 = vpop.permute.xlu0 %1098 }
0x153f   :  { %v1101_v58 = vmul.f32 %v1099_v56, %v1096_v28 }
0x1541   :  { %v1103_v59 = vadd.f32 %v1102_v57, %v1101_v58 }
0x1543   :  { %1105 = vrot.lane.b32.xlu1 %v1103_v59, %s1698_s4 }
0x15b5   :  { %v1106_v60 = vpop.permute.xlu1 %1105 }
0x15b6   :  { %1108 = vst.msk [vmem:[#allocation3 + $0x38] sm:$0xff] %vm199_vm4, %v1106_v60 }
0x15bd   :  { %v1116_v61 = vld [vmem:[#allocation3 + $0x38] sm:$0xff] }
0x15be   :  { %1549 = vmatmul.mubr.msk.f32.gmra.mrb[16].mxu0 %vm199_vm4, %v1116_v61 }
0x1691   :  { %v1550_v62 = vpop.f32.mrb[16].mxu0 }
0x1692   :  { %v1254_v63 = vadd.f32 %v1550_v62, %v1933_v49  ;;  %v1248_v0 = vpop.f32.mrb[17].mxu0 }
0x1693   :  { %v1249_v1 = vadd.f32 %v1933_v49, %v1248_v0 }
0x1694   :  { %v1367_v2 = vmul.f32 -1.442695, %v1254_v63 }
0x1695   :  { %v1366_v3 = vmul.f32 -1.442695, %v1249_v1 }
0x1696   :  { %1686 = vpow2.f32 %v1367_v2 }
0x1697   :  { %1688 = vpow2.f32 %v1366_v3 }
0x16a0   :  { %v1687_v4 = vpop.eup %1686 }
0x16a1   :  { %v1689_v5 = vpop.eup %1688  ;;  %v1288_v6 = vadd.f32 1.0, %v1687_v4 }
0x16a2   :  { %v1287_v7 = vadd.f32 1.0, %v1689_v5 }
0x16a3   :  { %1690 = vrcp.f32 %v1288_v6 }
0x16a4   :  { %1692 = vrcp.f32 %v1287_v7 }
0x16ad   :  { %v1691_v9 = vpop.eup %1690 }
0x16ae   :  { %v1693_v10 = vpop.eup %1692  ;;  %1313 = vst.msk [vmem:[%s1996_s7 + $0x38] sm:$0xff] %vm1305_vm5, %v1691_v9 }
0x16af   :  { %1312 = vst.msk [vmem:[%s1996_s7 + $0x30] sm:$0xff] %vm1305_vm5, %v1693_v10 }

</bundles_post_ra>
